<compile_context>
chip_gen: v7x
topology: tpu7x:2x2x1
jax: 0.10.0
libtpu: 0.0.40
codegen_flags: <defaults>
</compile_context>

<pallas_src>
import functools

import jax
import jax.numpy as jnp
from jax.experimental import pallas as pl
from jax.experimental.pallas import tpu as pltpu


# ---------------------------------------------------------------------------
# Fused Pallas kernel: backbone + neck (both streams) + correlation head
# ---------------------------------------------------------------------------
def _fpi_fused_kernel(zp_ref, xp_ref,
                      wbu_ref, bbu_ref, wbs_ref, bbs_ref,
                      wnu_ref, bnu_ref, wns_ref, bns_ref,
                      wh_ref, bh_ref, o_ref, *, B, Sz, Sx):
    """All intermediates stay in VMEM/vregs; only the heatmap hits HBM.

    zp_ref : (B*Sz, K)   UAV patch rows        (bf16)
    xp_ref : (B*Sx, K)   satellite patch rows  (bf16)
    wb*    : (K, C0)     backbone weights      (bf16)
    bb*    : (1, C0)     backbone biases       (fp32)
    wn*    : (C0, C0)    neck weights          (bf16)
    bn*    : (1, C0)     neck biases           (fp32)
    wh_ref : (1, C0)     head channel weight   (fp32)
    bh_ref : (1,)        head bias (SMEM scalar, fp32)
    o_ref  : (B, Sx)     lane-dense heatmap    (fp32)
    """
    # ---- UAV stream: backbone + neck fused (fp32 accumulation on MXU) ----
    fz = jnp.dot(zp_ref[...], wbu_ref[...], preferred_element_type=jnp.float32)
    fz = jnp.maximum(fz + bbu_ref[...], 0.0)
    nz = jnp.dot(fz.astype(wnu_ref.dtype), wnu_ref[...],
                 preferred_element_type=jnp.float32)
    nz = jnp.maximum(nz + bnu_ref[...], 0.0)                    # (B*Sz, C0) fp32

    # ---- Satellite stream: backbone + neck fused -------------------------
    fx = jnp.dot(xp_ref[...], wbs_ref[...], preferred_element_type=jnp.float32)
    fx = jnp.maximum(fx + bbs_ref[...], 0.0)
    nx = jnp.dot(fx.astype(wns_ref.dtype), wns_ref[...],
                 preferred_element_type=jnp.float32)
    nx = jnp.maximum(nx + bns_ref[...], 0.0)                    # (B*Sx, C0) fp32

    # ---- Head: GAP(UAV) channel-weighted correlation (fp32) --------------
    C0 = nz.shape[-1]
    desc = jnp.mean(nz.reshape(B, Sz, C0), axis=1)              # (B, C0)
    wvec = desc * wh_ref[...]                                   # (B, C0)
    heat = jnp.sum(nx.reshape(B, Sx, C0) * wvec[:, None, :], axis=-1)  # (B, Sx)
    o_ref[...] = (heat + bh_ref[0]).astype(o_ref.dtype)


def fpi_fused(zp, xp, params, *, B, Sz, Sx):
    """Single pallas_call (no grid) — every operand fits VMEM at these sizes."""
    vmem = pl.BlockSpec(memory_space=pltpu.MemorySpace.VMEM)
    smem = pl.BlockSpec(memory_space=pltpu.MemorySpace.SMEM)
    kernel = functools.partial(_fpi_fused_kernel, B=B, Sz=Sz, Sx=Sx)
    return pl.pallas_call(
        kernel,
        out_shape=jax.ShapeDtypeStruct((B, Sx), jnp.float32),
        in_specs=[vmem, vmem,                       # zp, xp
                  vmem, vmem, vmem, vmem,           # backbone w/b (uav, sat)
                  vmem, vmem, vmem, vmem,           # neck     w/b (uav, sat)
                  vmem, smem],                      # head w, head b (scalar)
        out_specs=vmem,
    )(zp, xp,
      params["backbone_uav_w"], params["backbone_uav_b"],
      params["backbone_sat_w"], params["backbone_sat_b"],
      params["neck_uav_w"], params["neck_uav_b"],
      params["neck_sat_w"], params["neck_sat_b"],
      params["head_w"], params["head_b"])


# ---------------------------------------------------------------------------
# Glue (reshapes / parameter setup) — plain JAX, kept inside the same jit
# ---------------------------------------------------------------------------
def _extract_patches(img_nchw, patch):
    """NCHW -> (B*Hp*Wp, Cin*P*P) bf16 patch rows; vector order (cin, ph, pw)."""
    B, Cin, H, W = img_nchw.shape
    assert H % patch == 0 and W % patch == 0, "H, W must be divisible by patch"
    Hp, Wp = H // patch, W // patch
    # TODO(synk): fold this transpose into the kernel via a BlockSpec index_map
    # over (B, Hp, Wp) to avoid one full image round-trip through HBM at
    # production image sizes.
    x = img_nchw.reshape(B, Cin, Hp, patch, Wp, patch)
    x = x.transpose(0, 2, 4, 1, 3, 5)                  # (B, Hp, Wp, Cin, P, P)
    x = x.reshape(B * Hp * Wp, Cin * patch * patch)
    return x.astype(jnp.bfloat16), (Hp, Wp)


def init_fpi_params(key, in_ch=3, patch=4, c0=32):
    """Deterministic synthetic parameters (no checkpoint loading)."""
    ks = jax.random.split(key, 5)
    kdim = in_ch * patch * patch

    def _w(k, shape, fan, dtype):
        w = jax.random.normal(k, shape, jnp.float32) / jnp.sqrt(jnp.float32(fan))
        return w.astype(dtype)

    return {
        # backbone_uav / backbone_satellite (patch-embed convs) — bf16 weights
        "backbone_uav_w": _w(ks[0], (kdim, c0), kdim, jnp.bfloat16),
        "backbone_uav_b": jnp.zeros((1, c0), jnp.float32),
        "backbone_sat_w": _w(ks[1], (kdim, c0), kdim, jnp.bfloat16),
        "backbone_sat_b": jnp.zeros((1, c0), jnp.float32),
        # neck_uav / neck_satellite (1x1 convs, C0 -> C0 = neck_output_channel)
        "neck_uav_w": _w(ks[2], (c0, c0), c0, jnp.bfloat16),
        "neck_uav_b": jnp.zeros((1, c0), jnp.float32),
        "neck_sat_w": _w(ks[3], (c0, c0), c0, jnp.bfloat16),
        "neck_sat_b": jnp.zeros((1, c0), jnp.float32),
        # head (channel-weighted correlation + scalar bias, fp32)
        "head_w": _w(ks[4], (1, c0), c0, jnp.float32),
        "head_b": jnp.zeros((1,), jnp.float32),
    }


@functools.partial(jax.jit, static_argnames=("patch",))
def fpi_forward(params, z, x, patch=4):
    """Mirrors FPI.forward: returns (cls_out, None)."""
    B = z.shape[0]

    # z = backbone_uav(z); x = backbone_satellite(x); neck_*; head(...)
    # — all fused into ONE Pallas kernel; only the heatmap is written to HBM.
    zp, (Hz, Wz) = _extract_patches(z, patch)
    xp, (Hx, Wx) = _extract_patches(x, patch)
    Sz, Sx = Hz * Wz, Hx * Wx

    heat = fpi_fused(zp, xp, params, B=B, Sz=Sz, Sx=Sx)     # (B, Sx) fp32
    cls_out = heat.reshape(B, 1, Hx, Wx)                    # NCHW (B, 1, Hs, Ws)
    return cls_out, None


# ---------------------------------------------------------------------------
# Demo
# ---------------------------------------------------------------------------
if __name__ == "__main__":
    key = jax.random.PRNGKey(0)
    kz, kx, kp = jax.random.split(key, 3)

    B, Cin = 2, 3
    UAVhw = (16, 16)        # opt.UAVhw
    Sathw = (32, 32)        # opt.Satellitehw
    patch, C0 = 4, 32       # backbone stride / backbone_out_channel[0]

    z = jax.random.normal(kz, (B, Cin) + UAVhw, jnp.float32)   # UAV image
    x = jax.random.normal(kx, (B, Cin) + Sathw, jnp.float32)   # satellite image
    params = init_fpi_params(kp, in_ch=Cin, patch=patch, c0=C0)

    cls_out, aux = fpi_forward(params, z, x, patch=patch)
    cls_out = jax.block_until_ready(cls_out)

    assert cls_out.shape == (B, 1, Sathw[0] // patch, Sathw[1] // patch)
    assert aux is None
    assert bool(jnp.all(jnp.isfinite(cls_out)))
    print("KERNEL_OK")
</pallas_src>

<mosaic_0001>
module attributes {stable_mosaic.version = 11 : i64} {
  func.func @_fpi_fused_kernel(%arg0: memref<32x48xbf16, #tpu.memory_space<vmem>>, %arg1: memref<128x48xbf16, #tpu.memory_space<vmem>>, %arg2: memref<48x32xbf16, #tpu.memory_space<vmem>>, %arg3: memref<1x32xf32, #tpu.memory_space<vmem>>, %arg4: memref<48x32xbf16, #tpu.memory_space<vmem>>, %arg5: memref<1x32xf32, #tpu.memory_space<vmem>>, %arg6: memref<32x32xbf16, #tpu.memory_space<vmem>>, %arg7: memref<1x32xf32, #tpu.memory_space<vmem>>, %arg8: memref<32x32xbf16, #tpu.memory_space<vmem>>, %arg9: memref<1x32xf32, #tpu.memory_space<vmem>>, %arg10: memref<1x32xf32, #tpu.memory_space<vmem>>, %arg11: memref<1xf32, #tpu.memory_space<smem>>, %arg12: memref<2x64xf32, #tpu.memory_space<vmem>>) attributes {dimension_semantics = [], scalar_prefetch = 0 : i64, scratch_operands = 0 : i64, tpu.core_type = #tpu.core_type<tc>} {
    %c0 = arith.constant 0 : index
    %c0_0 = arith.constant 0 : index
    %0 = vector.load %arg0[%c0, %c0_0] : memref<32x48xbf16, #tpu.memory_space<vmem>>, vector<32x48xbf16>
    %c0_1 = arith.constant 0 : index
    %c0_2 = arith.constant 0 : index
    %1 = vector.load %arg2[%c0_1, %c0_2] : memref<48x32xbf16, #tpu.memory_space<vmem>>, vector<48x32xbf16>
    %cst = arith.constant dense<0.000000e+00> : vector<32x32xf32>
    %2 = tpu.matmul %0, %1, %cst {dimension_numbers = #tpu.dot_dimension_numbers<[1], [0], [0], [1], [0, 0, 1, 1], [], []>} : vector<32x48xbf16>, vector<48x32xbf16>, vector<32x32xf32> -> vector<32x32xf32>
    %c0_3 = arith.constant 0 : index
    %c0_4 = arith.constant 0 : index
    %3 = vector.load %arg3[%c0_3, %c0_4] : memref<1x32xf32, #tpu.memory_space<vmem>>, vector<1x32xf32>
    %4 = vector.broadcast %3 : vector<1x32xf32> to vector<32x32xf32>
    %5 = arith.addf %2, %4 : vector<32x32xf32>
    %cst_5 = arith.constant 0.000000e+00 : f32
    %6 = vector.broadcast %cst_5 : f32 to vector<32x32xf32>
    %7 = arith.maximumf %5, %6 : vector<32x32xf32>
    %8 = arith.truncf %7 : vector<32x32xf32> to vector<32x32xbf16>
    %c0_6 = arith.constant 0 : index
    %c0_7 = arith.constant 0 : index
    %9 = vector.load %arg6[%c0_6, %c0_7] : memref<32x32xbf16, #tpu.memory_space<vmem>>, vector<32x32xbf16>
    %cst_8 = arith.constant dense<0.000000e+00> : vector<32x32xf32>
    %10 = tpu.matmul %8, %9, %cst_8 {dimension_numbers = #tpu.dot_dimension_numbers<[1], [0], [0], [1], [0, 0, 1, 1], [], []>} : vector<32x32xbf16>, vector<32x32xbf16>, vector<32x32xf32> -> vector<32x32xf32>
    %c0_9 = arith.constant 0 : index
    %c0_10 = arith.constant 0 : index
    %11 = vector.load %arg7[%c0_9, %c0_10] : memref<1x32xf32, #tpu.memory_space<vmem>>, vector<1x32xf32>
    %12 = vector.broadcast %11 : vector<1x32xf32> to vector<32x32xf32>
    %13 = arith.addf %10, %12 : vector<32x32xf32>
    %cst_11 = arith.constant 0.000000e+00 : f32
    %14 = vector.broadcast %cst_11 : f32 to vector<32x32xf32>
    %15 = arith.maximumf %13, %14 : vector<32x32xf32>
    %c0_12 = arith.constant 0 : index
    %c0_13 = arith.constant 0 : index
    %16 = vector.load %arg1[%c0_12, %c0_13] : memref<128x48xbf16, #tpu.memory_space<vmem>>, vector<128x48xbf16>
    %c0_14 = arith.constant 0 : index
    %c0_15 = arith.constant 0 : index
    %17 = vector.load %arg4[%c0_14, %c0_15] : memref<48x32xbf16, #tpu.memory_space<vmem>>, vector<48x32xbf16>
    %cst_16 = arith.constant dense<0.000000e+00> : vector<128x32xf32>
    %18 = tpu.matmul %16, %17, %cst_16 {dimension_numbers = #tpu.dot_dimension_numbers<[1], [0], [0], [1], [0, 0, 1, 1], [], []>} : vector<128x48xbf16>, vector<48x32xbf16>, vector<128x32xf32> -> vector<128x32xf32>
    %c0_17 = arith.constant 0 : index
    %c0_18 = arith.constant 0 : index
    %19 = vector.load %arg5[%c0_17, %c0_18] : memref<1x32xf32, #tpu.memory_space<vmem>>, vector<1x32xf32>
    %20 = vector.broadcast %19 : vector<1x32xf32> to vector<128x32xf32>
    %21 = arith.addf %18, %20 : vector<128x32xf32>
    %cst_19 = arith.constant 0.000000e+00 : f32
    %22 = vector.broadcast %cst_19 : f32 to vector<128x32xf32>
    %23 = arith.maximumf %21, %22 : vector<128x32xf32>
    %24 = arith.truncf %23 : vector<128x32xf32> to vector<128x32xbf16>
    %c0_20 = arith.constant 0 : index
    %c0_21 = arith.constant 0 : index
    %25 = vector.load %arg8[%c0_20, %c0_21] : memref<32x32xbf16, #tpu.memory_space<vmem>>, vector<32x32xbf16>
    %cst_22 = arith.constant dense<0.000000e+00> : vector<128x32xf32>
    %26 = tpu.matmul %24, %25, %cst_22 {dimension_numbers = #tpu.dot_dimension_numbers<[1], [0], [0], [1], [0, 0, 1, 1], [], []>} : vector<128x32xbf16>, vector<32x32xbf16>, vector<128x32xf32> -> vector<128x32xf32>
    %c0_23 = arith.constant 0 : index
    %c0_24 = arith.constant 0 : index
    %27 = vector.load %arg9[%c0_23, %c0_24] : memref<1x32xf32, #tpu.memory_space<vmem>>, vector<1x32xf32>
    %28 = vector.broadcast %27 : vector<1x32xf32> to vector<128x32xf32>
    %29 = arith.addf %26, %28 : vector<128x32xf32>
    %cst_25 = arith.constant 0.000000e+00 : f32
    %30 = vector.broadcast %cst_25 : f32 to vector<128x32xf32>
    %31 = arith.maximumf %29, %30 : vector<128x32xf32>
    %32 = vector.shape_cast %15 : vector<32x32xf32> to vector<2x16x32xf32>
    %cst_26 = arith.constant dense<0.000000e+00> : vector<2x32xf32>
    %33 = vector.multi_reduction <add>, %32, %cst_26 [1] : vector<2x16x32xf32> to vector<2x32xf32>
    %cst_27 = arith.constant 1.600000e+01 : f32
    %34 = vector.broadcast %cst_27 : f32 to vector<2x32xf32>
    %35 = arith.divf %33, %34 : vector<2x32xf32>
    %c0_28 = arith.constant 0 : index
    %c0_29 = arith.constant 0 : index
    %36 = vector.load %arg10[%c0_28, %c0_29] : memref<1x32xf32, #tpu.memory_space<vmem>>, vector<1x32xf32>
    %37 = vector.broadcast %36 : vector<1x32xf32> to vector<2x32xf32>
    %38 = arith.mulf %35, %37 : vector<2x32xf32>
    %39 = vector.shape_cast %31 : vector<128x32xf32> to vector<2x64x32xf32>
    %40 = vector.shape_cast %38 : vector<2x32xf32> to vector<2x1x32xf32>
    %41 = vector.broadcast %40 : vector<2x1x32xf32> to vector<2x64x32xf32>
    %42 = arith.mulf %39, %41 : vector<2x64x32xf32>
    %cst_30 = arith.constant dense<0.000000e+00> : vector<2x64xf32>
    %43 = vector.multi_reduction <add>, %42, %cst_30 [2] : vector<2x64x32xf32> to vector<2x64xf32>
    %c0_31 = arith.constant 0 : index
    %44 = memref.load %arg11[%c0_31] : memref<1xf32, #tpu.memory_space<smem>>
    %45 = vector.broadcast %44 : f32 to vector<2x64xf32>
    %46 = arith.addf %43, %45 : vector<2x64xf32>
    %c0_32 = arith.constant 0 : index
    %c0_33 = arith.constant 0 : index
    %47 = vector.load %arg12[%c0_32, %c0_33] : memref<2x64xf32, #tpu.memory_space<vmem>>, vector<2x64xf32>
    tpu.vector_store %arg12[%c0_32, %c0_33], %46 {strides = array<i32>} : memref<2x64xf32, #tpu.memory_space<vmem>>, vector<2x64xf32>,
    return
  }
}

</mosaic_0001>

<bundles_post_ra>
// kernel: fpi_forward.1
= control target key start
LH: loop header
LB: loop body
LE: loop exit
PB: predicated region body
PF: predicated region fallthrough
CT: control target
= control target key end

     0   :  { %vm88_vm0 = vcmask 392192   ;;  %vm173_vm1 = vcmask 261120   ;;  %vm772_vm2 = vcmask 130112   ;;  %vm779_vm3 = vcmask 195712   ;;  %s1270_s2 = inlined_call_operand.vmem [shape: bf16[48,32], index: 2, kind: input, shape index: {}]   ;;  %s1271_s0 = inlined_call_operand.vmem [shape: bf16[32,48], index: 0, kind: input, shape index: {}]   ;;  %s1272_s6 = inlined_call_operand.vmem [shape: bf16[32,32], index: 6, kind: input, shape index: {}]   ;;  %s1273_s4 = inlined_call_operand.vmem [shape: bf16[48,32], index: 4, kind: input, shape index: {}]   ;;  %s1274_s1 = inlined_call_operand.vmem [shape: bf16[128,48], index: 1, kind: input, shape index: {}]   ;;  %s1275_s3 = inlined_call_operand.vmem [shape: f32[1,32], index: 3, kind: input, shape index: {}]   ;;  %s1276_s8 = inlined_call_operand.vmem [shape: bf16[32,32], index: 8, kind: input, shape index: {}]   ;;  %s1277_s7 = inlined_call_operand.vmem [shape: f32[1,32], index: 7, kind: input, shape index: {}]   ;;  %s1278_s5 = inlined_call_operand.vmem [shape: f32[1,32], index: 5, kind: input, shape index: {}]   ;;  %s1279_s10 = inlined_call_operand.vmem [shape: f32[1,32], index: 10, kind: input, shape index: {}]   ;;  %s1280_s9 = inlined_call_operand.vmem [shape: f32[1,32], index: 9, kind: input, shape index: {}]   ;;  %s1281_s11 = inlined_call_operand.<no memory space> [shape: f32[1], index: 11, kind: input, shape index: {}]   ;;  %s1282_s12 = inlined_call_operand.vmem [shape: f32[2,64], index: 12, kind: output, shape index: {}]  }
   0x1   :  { %v999_v0 = vld [vmem:[%s1270_s2] sm:$0xff]   ;;  %v1000_v1 = vld [vmem:[%s1270_s2 + $0x8] sm:$0xff]   ;;  %v1001_v3 = vld [vmem:[%s1270_s2 + $0x10] sm:$0xff]   ;;  %vm786_vm4 = vcmask 261312   ;;  %vm793_vm5 = vcmask 326912   ;;  %vm800_vm6 = vcmask 392512  }
   0x2   :  { %939 = vmatprep.subr.bf16.mxu0 %v999_v0  ;;  %v1002_v2 = vld [vmem:[%s1271_s0] sm:$0xff]   ;;  %v1003_v4 = vld [vmem:[%s1271_s0 + $0x8] sm:$0xff]   ;;  %v1008_v25 = vld [vmem:[%s1273_s4 + $0x10] sm:$0xff]   ;;  %vm807_vm7 = vcmask 458112   ;;  %vm814_vm8 = vcmask 523712   ;;  %vm855_vm9 = vcmask 1041409  }
   0x3   :  { %940 = vmatpush3.bf16.msra.mxu0 %v999_v0  ;;  %945 = vmatprep.mubr.msk.bf16.mxu0 %vm88_vm0, %v1002_v2  ;;  %v1004_v5 = vld [vmem:[%s1272_s6] sm:$0xff]   ;;  %v1005_v6 = vld [vmem:[%s1272_s6 + $0x8] sm:$0xff]   ;;  %v1011_v27 = vld [vmem:[%s1274_s1 + $0x10] sm:$0xff]   ;;  %vm858_vm10 = vcmask 517120  }
   0x4   :  { %941 = vmatprep.subr.bf16.mxu0 %v1000_v1  ;;  %949 = vmatprep.subr.bf16.mxu1 %v1004_v5  ;;  %v1006_v7 = vld [vmem:[%s1273_s4] sm:$0xff]   ;;  %v1007_v24 = vld [vmem:[%s1273_s4 + $0x8] sm:$0xff]   ;;  %v1012_v28 = vld [vmem:[%s1274_s1 + $0x18] sm:$0xff]  }
   0x5   :  { %950 = vmatpush3.bf16.msra.mxu1 %v1004_v5  ;;  %v864_v8 = vld [vmem:[%s1275_s3] ss:$0 sm:$0xff]  ;;  %v1010_v26 = vld [vmem:[%s1274_s1 + $0x8] sm:$0xff]   ;;  %v1015_v31 = vld [vmem:[%s1274_s1 + $0x30] sm:$0xff]  }
   0x6   :  { %951 = vmatprep.subr.bf16.mxu1 %v1005_v6  ;;  %v1009_v23 = vld [vmem:[%s1274_s1] sm:$0xff]   ;;  %v1014_v30 = vld [vmem:[%s1274_s1 + $0x28] sm:$0xff]   ;;  %v1016_v32 = vld [vmem:[%s1274_s1 + $0x38] sm:$0xff]  }
   0x7   :  { %942 = vmatpush3.bf16.msra.mxu0 %v1000_v1  ;;  %v1013_v29 = vld [vmem:[%s1274_s1 + $0x20] sm:$0xff]   ;;  %v1018_v34 = vld [vmem:[%s1276_s8 + $0x8] sm:$0xff]  }
   0x8   :  { %943 = vmatprep.subr.bf16.mxu0 %v1001_v3  ;;  %v1017_v33 = vld [vmem:[%s1276_s8] sm:$0xff]  }
   0x9   :  { %952 = vmatpush3.bf16.msra.mxu1 %v1005_v6  ;;  %v872_v35 = vld [vmem:[%s1277_s7] ss:$0 sm:$0xff] }
   0xa   :  { %957 = vmatprep.subr.bf16.mxu1 %v1006_v7  ;;  %v877_v54 = vld [vmem:[%s1278_s5] ss:$0 sm:$0xff] }
   0xb   :  { %944 = vmatpush3.bf16.msra.mxu0 %v1001_v3 }
   0xc   :  { %979 = vmatprep.subr.bf16.mxu0 %v1017_v33 }
   0xe   :  { %946 = vmatmul.mubr.msk.bf16.vlgmr.msra.gmra.mrb[0].mxu0 %vm88_vm0, %v1003_v4 }
   0xf   :  { %980 = vmatpush3.bf16.msra.mxu0 %v1017_v33 }
  0x10   :  { %981 = vmatprep.subr.bf16.mxu0 %v1018_v34 }
  0x13   :  { %982 = vmatpush3.bf16.msra.mxu0 %v1018_v34 }
  0xe1   :  { %v947_v9 = vpop.f32.mrb[0].mxu0 }
  0xe2   :  { %v138_v10 = vadd.f32 %v947_v9, %v864_v8  ;;  %v129_v11 = vpop.f32.mrb[1].mxu0 }
  0xe3   :  { %v130_v12 = vadd.f32 %v864_v8, %v129_v11  ;;  %v948_v13 = vpop.f32.mrb[2].mxu0 }
  0xe4   :  { %v141_v14 = vadd.f32 %v948_v13, %v864_v8  ;;  %v132_v15 = vpop.f32.mrb[3].mxu0  ;;  %v146_v17 = vmax.f32 %v138_v10, 0.0 }
  0xe5   :  { %v133_v16 = vadd.f32 %v864_v8, %v132_v15  ;;  %v144_v19 = vmax.f32 %v130_v12, 0.0 }
  0xe6   :  { %v147_v18 = vmax.f32 %v141_v14, 0.0 }
  0xe7   :  { %v145_v20 = vmax.f32 %v133_v16, 0.0 }
  0xe8   :  { %v149_v21 = vpack.c.bf16 %v147_v18, %v146_v17 }
  0xe9   :  { %v148_v22 = vpack.c.bf16 %v145_v20, %v144_v19 }
  0xeb   :  { %953 = vmatprep.mubr.msk.bf16.mxu1 %vm173_vm1, %v148_v22 }
  0xec   :  { %954 = vmatmul.mubr.msk.bf16.vlgmr.msra.gmra.mrb[0].mxu1 %vm173_vm1, %v149_v21 }
  0xed   :  { %958 = vmatpush3.bf16.msra.mxu1 %v1006_v7  ;;  %963 = vmatprep.mubr.msk.bf16.mxu1 %vm88_vm0, %v1009_v23 }
  0xee   :  { %959 = vmatprep.subr.bf16.mxu1 %v1007_v24 }
  0xf1   :  { %960 = vmatpush3.bf16.msra.mxu1 %v1007_v24 }
  0xf2   :  { %961 = vmatprep.subr.bf16.mxu1 %v1008_v25 }
  0xf5   :  { %962 = vmatpush3.bf16.msra.mxu1 %v1008_v25 }
  0xf8   :  { %964 = vmatmul.mubr.msk.bf16.vlgmr.msra.gmra.mrb[4].mxu1 %vm88_vm0, %v1010_v26 }
  0xf9   :  { %967 = vmatprep.mubr.msk.bf16.mxu1 %vm88_vm0, %v1011_v27 }
 0x100   :  { %968 = vmatmul.mubr.msk.bf16.gmra.mrb[8].mxu1 %vm88_vm0, %v1012_v28 }
 0x101   :  { %971 = vmatprep.mubr.msk.bf16.mxu1 %vm88_vm0, %v1013_v29 }
 0x108   :  { %972 = vmatmul.mubr.msk.bf16.gmra.mrb[12].mxu1 %vm88_vm0, %v1014_v30 }
 0x109   :  { %975 = vmatprep.mubr.msk.bf16.mxu1 %vm88_vm0, %v1015_v31 }
 0x110   :  { %976 = vmatmul.mubr.msk.bf16.gmra.mrb[16].mxu1 %vm88_vm0, %v1016_v32 }
 0x1bf   :  { %v955_v36 = vpop.f32.mrb[0].mxu1 }
 0x1c0   :  { %v223_v37 = vadd.f32 %v955_v36, %v872_v35  ;;  %v214_v38 = vpop.f32.mrb[1].mxu1 }
 0x1c1   :  { %v215_v39 = vadd.f32 %v872_v35, %v214_v38  ;;  %v956_v40 = vpop.f32.mrb[2].mxu1 }
 0x1c2   :  { %v231_v41 = vmax.f32 %v223_v37, 0.0  ;;  %v226_v42 = vadd.f32 %v956_v40, %v872_v35  ;;  %v217_v43 = vpop.f32.mrb[3].mxu1 }
 0x1c3   :  { %v229_v44 = vmax.f32 %v215_v39, 0.0  ;;  %v218_v45 = vadd.f32 %v872_v35, %v217_v43 }
 0x1c4   :  { %v232_v46 = vmax.f32 %v226_v42, 0.0  ;;  %v634_v48 = vsel %vm173_vm1, %v231_v41, 0.0 }
 0x1c5   :  { %v230_v47 = vmax.f32 %v218_v45, 0.0  ;;  %v625_v50 = vsel %vm173_vm1, %v229_v44, 0.0 }
 0x1c6   :  { %v635_v49 = vsel %vm173_vm1, %v232_v46, 0.0 }
 0x1c7   :  { %v1165_v51 = vadd.f32 %v635_v49, %v634_v48  ;;  %v626_v52 = vsel %vm173_vm1, %v230_v47, 0.0 }
 0x1c8   :  { %v1168_v53 = vadd.f32 %v626_v52, %v625_v50 }
 0x1c9   :  { %v637_v52 = vrot.slane %v1165_v51, 4 }
 0x1ca   :  { %v628_v47 = vrot.slane %v1168_v53, 4 }
 0x1cb   :  { %v965_v55 = vpop.f32.mrb[4].mxu1 }
 0x1cc   :  { %v387_v56 = vadd.f32 %v965_v55, %v877_v54  ;;  %v378_v57 = vpop.f32.mrb[5].mxu1  ;;  %v629_v48 = vadd.f32 %v628_v47, %v1168_v53  ;;  %v1194_v53 = vld [vmem:[%s1280_s9] ss:$0 sm:$0xff] }
 0x1cd   :  { %v379_v58 = vadd.f32 %v877_v54, %v378_v57  ;;  %v966_v59 = vpop.f32.mrb[6].mxu1 }
 0x1ce   :  { %v390_v60 = vadd.f32 %v966_v59, %v877_v54  ;;  %v381_v61 = vpop.f32.mrb[7].mxu1  ;;  %v443_v63 = vmax.f32 %v387_v56, 0.0  ;;  %v630_v49 = vrot.slane %v629_v48, 2  ;;  %v638_v56 = vadd.f32 %v637_v52, %v1165_v51 }
 0x1cf   :  { %v382_v62 = vadd.f32 %v877_v54, %v381_v61  ;;  %v441_v1 = vmax.f32 %v379_v58, 0.0  ;;  %v908_v61 = vld [vmem:[%s1279_s10] ss:$0 sm:$0xff] }
 0x1d0   :  { %v444_v0 = vmax.f32 %v390_v60, 0.0  ;;  %v631_v50 = vadd.f32 %v630_v49, %v629_v48  ;;  %v639_v58 = vrot.slane %v638_v56, 2 }
 0x1d1   :  { %v442_v2 = vmax.f32 %v382_v62, 0.0 }
 0x1d2   :  { %v458_v3 = vpack.c.bf16 %v444_v0, %v443_v63  ;;  %v632_v55 = vrot.slane %v631_v50, 1  ;;  %v640_v62 = vadd.f32 %v639_v58, %v638_v56 }
 0x1d3   :  { %v457_v4 = vpack.c.bf16 %v442_v2, %v441_v1  ;;  %v969_v5 = vpop.f32.mrb[8].mxu1 }
 0x1d4   :  { %v403_v6 = vadd.f32 %v969_v5, %v877_v54  ;;  %v394_v7 = vpop.f32.mrb[9].mxu1  ;;  %v633_v57 = vadd.f32 %v632_v55, %v631_v50  ;;  %v641_v5 = vrot.slane %v640_v62, 1 }
 0x1d5   :  { %v395_v8 = vadd.f32 %v877_v54, %v394_v7  ;;  %v970_v9 = vpop.f32.mrb[10].mxu1  ;;  %983 = vmatprep.mubr.msk.bf16.mxu0 %vm173_vm1, %v457_v4 }
 0x1d6   :  { %v406_v10 = vadd.f32 %v970_v9, %v877_v54  ;;  %v397_v11 = vpop.f32.mrb[11].mxu1  ;;  %984 = vmatmul.mubr.msk.bf16.vlgmr.msra.gmra.mrb[4].mxu0 %vm173_vm1, %v458_v3  ;;  %v447_v13 = vmax.f32 %v403_v6, 0.0  ;;  %v644_v60 = vmul.f32 0.0625, %v633_v57 }
 0x1d7   :  { %v398_v12 = vadd.f32 %v877_v54, %v397_v11  ;;  %v445_v15 = vmax.f32 %v395_v8, 0.0 }
 0x1d8   :  { %v448_v14 = vmax.f32 %v406_v10, 0.0  ;;  %v653_v51 = vmul.f32 %v908_v61, %v644_v60 }
 0x1d9   :  { %v446_v16 = vmax.f32 %v398_v12, 0.0 }
 0x1da   :  { %v460_v17 = vpack.c.bf16 %v448_v14, %v447_v13 }
 0x1db   :  { %v459_v18 = vpack.c.bf16 %v446_v16, %v445_v15  ;;  %v973_v19 = vpop.f32.mrb[12].mxu1  ;;  %v642_v16 = vadd.f32 %v641_v5, %v640_v62 }
 0x1dc   :  { %v419_v20 = vadd.f32 %v973_v19, %v877_v54  ;;  %v410_v21 = vpop.f32.mrb[13].mxu1 }
 0x1dd   :  { %v411_v22 = vadd.f32 %v877_v54, %v410_v21  ;;  %v974_v23 = vpop.f32.mrb[14].mxu1  ;;  %987 = vmatprep.mubr.msk.bf16.mxu0 %vm173_vm1, %v459_v18 }
 0x1de   :  { %v422_v24 = vadd.f32 %v974_v23, %v877_v54  ;;  %v413_v25 = vpop.f32.mrb[15].mxu1  ;;  %988 = vmatmul.mubr.msk.bf16.gmra.mrb[8].mxu0 %vm173_vm1, %v460_v17  ;;  %v451_v27 = vmax.f32 %v419_v20, 0.0 }
 0x1df   :  { %v414_v26 = vadd.f32 %v877_v54, %v413_v25  ;;  %v449_v29 = vmax.f32 %v411_v22, 0.0  ;;  %v645_v25 = vmul.f32 0.0625, %v642_v16 }
 0x1e0   :  { %v452_v28 = vmax.f32 %v422_v24, 0.0 }
 0x1e1   :  { %v450_v30 = vmax.f32 %v414_v26, 0.0 }
 0x1e2   :  { %v462_v31 = vpack.c.bf16 %v452_v28, %v451_v27 }
 0x1e3   :  { %v461_v32 = vpack.c.bf16 %v450_v30, %v449_v29  ;;  %v977_v33 = vpop.f32.mrb[16].mxu1 }
 0x1e4   :  { %v435_v34 = vadd.f32 %v977_v33, %v877_v54  ;;  %v426_v35 = vpop.f32.mrb[17].mxu1 }
 0x1e5   :  { %v427_v36 = vadd.f32 %v877_v54, %v426_v35  ;;  %v978_v37 = vpop.f32.mrb[18].mxu1  ;;  %991 = vmatprep.mubr.msk.bf16.mxu0 %vm173_vm1, %v461_v32 }
 0x1e6   :  { %v455_v38 = vmax.f32 %v435_v34, 0.0  ;;  %v438_v39 = vadd.f32 %v978_v37, %v877_v54  ;;  %v429_v40 = vpop.f32.mrb[19].mxu1  ;;  %992 = vmatmul.mubr.msk.bf16.gmra.mrb[12].mxu0 %vm173_vm1, %v462_v31 }
 0x1e7   :  { %v453_v41 = vmax.f32 %v427_v36, 0.0  ;;  %v430_v42 = vadd.f32 %v877_v54, %v429_v40  ;;  %v655_v54 = vlaneseq  ;;  %v654_v36 = vmul.f32 %v908_v61, %v645_v25 }
 0x1e8   :  { %v456_v43 = vmax.f32 %v438_v39, 0.0 }
 0x1e9   :  { %v454_v44 = vmax.f32 %v430_v42, 0.0  ;;  %v1186_v59 = vshrl.u32 %v655_v54, 7 }
 0x1ea   :  { %v464_v45 = vpack.c.bf16 %v456_v43, %v455_v38 }
 0x1eb   :  { %v463_v46 = vpack.c.bf16 %v454_v44, %v453_v41  ;;  %v657_v63 = vsub.s32 0, %v1186_v59 }
 0x1ed   :  { %995 = vmatprep.mubr.msk.bf16.mxu0 %vm173_vm1, %v463_v46  ;;  %v658_v6 = vrot.slane %v653_v51, %v657_v63 }
 0x1ee   :  { %996 = vmatmul.mubr.msk.bf16.gmra.mrb[16].mxu0 %vm173_vm1, %v464_v45  ;;  %v662_v45 = vrot.slane %v654_v36, %v657_v63 }
 0x2a9   :  { %v985_v0 = vpop.f32.mrb[4].mxu0 }
 0x2aa   :  { %v555_v1 = vadd.f32 %v985_v0, %v1194_v53  ;;  %v546_v2 = vpop.f32.mrb[5].mxu0 }
 0x2ab   :  { %v547_v3 = vadd.f32 %v1194_v53, %v546_v2  ;;  %v986_v4 = vpop.f32.mrb[6].mxu0 }
 0x2ac   :  { %v611_v7 = vmax.f32 %v555_v1, 0.0  ;;  %v558_v8 = vadd.f32 %v986_v4, %v1194_v53  ;;  %v549_v9 = vpop.f32.mrb[7].mxu0 }
 0x2ad   :  { %v609_v10 = vmax.f32 %v547_v3, 0.0  ;;  %v550_v11 = vadd.f32 %v1194_v53, %v549_v9 }
 0x2ae   :  { %v612_v12 = vmax.f32 %v558_v8, 0.0  ;;  %v665_v13 = vmul.f32 %v658_v6, %v611_v7 }
 0x2af   :  { %v610_v14 = vmax.f32 %v550_v11, 0.0  ;;  %v663_v15 = vmul.f32 %v658_v6, %v609_v10 }
 0x2b0   :  { %v685_v17 = vsel %vm173_vm1, %v665_v13, 0.0  ;;  %v666_v18 = vmul.f32 %v658_v6, %v612_v12 }
 0x2b1   :  { %v989_v19 = vpop.f32.mrb[8].mxu0  ;;  %686 = vadd.xlane.f32.xlu0 %v685_v17  ;;  %v664_v20 = vmul.f32 %v658_v6, %v610_v14  ;;  %v679_v29 = vsel %vm173_vm1, %v663_v15, 0.0 }
 0x2b2   :  { %v571_v21 = vadd.f32 %v989_v19, %v1194_v53  ;;  %v562_v22 = vpop.f32.mrb[9].mxu0  ;;  %v688_v37 = vsel %vm173_vm1, %v666_v18, 0.0 }
 0x2b3   :  { %v563_v23 = vadd.f32 %v1194_v53, %v562_v22  ;;  %v990_v24 = vpop.f32.mrb[10].mxu0  ;;  %v682_v49 = vsel %vm173_vm1, %v664_v20, 0.0 }
 0x2b4   :  { %v615_v26 = vmax.f32 %v571_v21, 0.0  ;;  %v574_v27 = vadd.f32 %v990_v24, %v1194_v53  ;;  %v565_v28 = vpop.f32.mrb[11].mxu0 }
 0x2b5   :  { %v613_v30 = vmax.f32 %v563_v23, 0.0  ;;  %v566_v31 = vadd.f32 %v1194_v53, %v565_v28  ;;  %680 = vadd.xlane.f32.xlu0 %v679_v29 }
 0x2b6   :  { %v616_v32 = vmax.f32 %v574_v27, 0.0  ;;  %v669_v33 = vmul.f32 %v658_v6, %v615_v26 }
 0x2b7   :  { %v614_v34 = vmax.f32 %v566_v31, 0.0  ;;  %v667_v35 = vmul.f32 %v658_v6, %v613_v30  ;;  %v762_v31 = vand.u32 127, %v655_v54 }
 0x2b8   :  { %v670_v38 = vmul.f32 %v658_v6, %v616_v32  ;;  %v697_v61 = vsel %vm173_vm1, %v669_v33, 0.0 }
 0x2b9   :  { %v993_v39 = vpop.f32.mrb[12].mxu0  ;;  %689 = vadd.xlane.f32.xlu0 %v688_v37  ;;  %v668_v40 = vmul.f32 %v658_v6, %v614_v34  ;;  %v691_v8 = vsel %vm173_vm1, %v667_v35, 0.0  ;;  %v767_v32 = vadd.s32 4294967288, %v762_v31  ;;  %v1233_v35 = vstv %s1281_s11 }
 0x2ba   :  { %v587_v41 = vadd.f32 %v993_v39, %v1194_v53  ;;  %v578_v42 = vpop.f32.mrb[13].mxu0  ;;  %v700_v20 = vsel %vm173_vm1, %v670_v38, 0.0  ;;  %v774_v39 = vadd.s32 4294967280, %v762_v31 }
 0x2bb   :  { %v579_v43 = vadd.f32 %v1194_v53, %v578_v42  ;;  %v994_v44 = vpop.f32.mrb[14].mxu0  ;;  %v694_v16 = vsel %vm173_vm1, %v668_v40, 0.0  ;;  %v770_v36 = vsub.s32 %v767_v32, %v1186_v59  ;;  %v781_v42 = vadd.s32 4294967272, %v762_v31 }
 0x2bc   :  { %v619_v46 = vmax.f32 %v587_v41, 0.0  ;;  %v590_v47 = vadd.f32 %v994_v44, %v1194_v53  ;;  %v581_v48 = vpop.f32.mrb[15].mxu0  ;;  %v765_v41 = vsub.s32 %v762_v31, %v1186_v59 }
 0x2bd   :  { %v617_v50 = vmax.f32 %v579_v43, 0.0  ;;  %v582_v52 = vadd.f32 %v1194_v53, %v581_v48  ;;  %683 = vadd.xlane.f32.xlu0 %v682_v49  ;;  %v777_v49 = vsub.s32 %v774_v39, %v1186_v59 }
 0x2be   :  { %v620_v55 = vmax.f32 %v590_v47, 0.0  ;;  %v673_v56 = vmul.f32 %v662_v45, %v619_v46  ;;  %v795_v46 = vadd.s32 4294967256, %v762_v31 }
 0x2bf   :  { %v618_v57 = vmax.f32 %v582_v52, 0.0  ;;  %v671_v58 = vmul.f32 %v662_v45, %v617_v50 }
 0x2c0   :  { %v709_v60 = vsel %vm173_vm1, %v673_v56, 0.0  ;;  %v674_v62 = vmul.f32 %v662_v45, %v620_v55  ;;  %v784_v56 = vsub.s32 %v781_v42, %v1186_v59 }
 0x2c1   :  { %710 = vadd.xlane.f32.xlu1 %v709_v60  ;;  %v997_v63 = vpop.f32.mrb[16].mxu0  ;;  %698 = vadd.xlane.f32.xlu0 %v697_v61  ;;  %v672_v51 = vmul.f32 %v662_v45, %v618_v57  ;;  %v703_v7 = vsel %vm173_vm1, %v671_v58, 0.0  ;;  %v809_v61 = vadd.s32 4294967240, %v762_v31 }
 0x2c2   :  { %v603_v0 = vadd.f32 %v997_v63, %v1194_v53  ;;  %v594_v1 = vpop.f32.mrb[17].mxu0  ;;  %v712_v15 = vsel %vm173_vm1, %v674_v62, 0.0 }
 0x2c3   :  { %v595_v2 = vadd.f32 %v1194_v53, %v594_v1  ;;  %v998_v3 = vpop.f32.mrb[18].mxu0  ;;  %v706_v19 = vsel %vm173_vm1, %v672_v51, 0.0 }
 0x2c4   :  { %v623_v4 = vmax.f32 %v603_v0, 0.0  ;;  %v606_v5 = vadd.f32 %v998_v3, %v1194_v53  ;;  %v597_v6 = vpop.f32.mrb[19].mxu0  ;;  %v798_v0 = vsub.s32 %v795_v46, %v1186_v59 }
 0x2c5   :  { %v621_v9 = vmax.f32 %v595_v2, 0.0  ;;  %v598_v10 = vadd.f32 %v1194_v53, %v597_v6  ;;  %704 = vadd.xlane.f32.xlu1 %v703_v7  ;;  %692 = vadd.xlane.f32.xlu0 %v691_v8  ;;  %v802_v8 = vadd.s32 4294967248, %v762_v31 }
 0x2c6   :  { %v624_v11 = vmax.f32 %v606_v5, 0.0  ;;  %v677_v12 = vmul.f32 %v662_v45, %v623_v4 }
 0x2c7   :  { %v622_v13 = vmax.f32 %v598_v10, 0.0  ;;  %v675_v14 = vmul.f32 %v662_v45, %v621_v9 }
 0x2c8   :  { %v678_v17 = vmul.f32 %v662_v45, %v624_v11  ;;  %v721_v53 = vsel %vm173_vm1, %v677_v12, 0.0  ;;  %v812_v11 = vsub.s32 %v809_v61, %v1186_v59 }
 0x2c9   :  { %713 = vadd.xlane.f32.xlu1 %v712_v15  ;;  %695 = vadd.xlane.f32.xlu0 %v694_v16  ;;  %v676_v18 = vmul.f32 %v662_v45, %v622_v13  ;;  %v715_v21 = vsel %vm173_vm1, %v675_v14, 0.0  ;;  %v788_v45 = vadd.s32 4294967264, %v762_v31 }
 0x2ca   :  { %v724_v23 = vsel %vm173_vm1, %v678_v17, 0.0 }
 0x2cb   :  { %v718_v22 = vsel %vm173_vm1, %v676_v18, 0.0  ;;  %v791_v63 = vsub.s32 %v788_v45, %v1186_v59 }
 0x2cd   :  { %707 = vadd.xlane.f32.xlu1 %v706_v19  ;;  %701 = vadd.xlane.f32.xlu0 %v700_v20 }
 0x2d1   :  { %722 = vadd.xlane.f32.xlu1 %v721_v53  ;;  %v805_v53 = vsub.s32 %v802_v8, %v1186_v59 }
 0x2d5   :  { %716 = vadd.xlane.f32.xlu1 %v715_v21 }
 0x2d9   :  { %719 = vadd.xlane.f32.xlu1 %v718_v22 }
 0x2dd   :  { %725 = vadd.xlane.f32.xlu1 %v724_v23 }
 0x33e   :  { %v687_v24 = vpop.xlane.xlu0 %686 }
 0x33f   :  { %v731_v52 = vadd.f32 %v1233_v35, %v687_v24 }
 0x341   :  { %v778_v6 = vrot.slane %v731_v52, %v777_v49 }
 0x342   :  { %v681_v25 = vpop.xlane.xlu0 %680 }
 0x343   :  { %v729_v54 = vadd.f32 %v1233_v35, %v681_v25 }
 0x345   :  { %v766_v55 = vrot.slane %v729_v54, %v765_v41 }
 0x346   :  { %v690_v26 = vpop.xlane.xlu0 %689 }
 0x347   :  { %v732_v58 = vadd.f32 %v1233_v35, %v690_v26 }
 0x349   :  { %v785_v10 = vrot.slane %v732_v58, %v784_v56 }
 0x34a   :  { %v684_v27 = vpop.xlane.xlu0 %683 }
 0x34b   :  { %v730_v37 = vadd.f32 %v1233_v35, %v684_v27 }
 0x34d   :  { %v771_v44 = vrot.slane %v730_v37, %v770_v36 }
 0x34e   :  { %v711_v28 = vpop.xlane.xlu1 %710  ;;  %v699_v29 = vpop.xlane.xlu0 %698 }
 0x34f   :  { %v739_v57 = vadd.f32 %v1233_v35, %v711_v28  ;;  %v773_v62 = vsel %vm772_vm2, %v771_v44, %v766_v55  ;;  %v735_v21 = vadd.f32 %v1233_v35, %v699_v29 }
 0x350   :  { %v780_v12 = vsel %vm779_vm3, %v778_v6, %v773_v62 }
 0x351   :  { %v828_v7 = vrot.slane %v739_v57, %v777_v49  ;;  %v787_v23 = vsel %vm786_vm4, %v785_v10, %v780_v12  ;;  %v806_v29 = vrot.slane %v735_v21, %v805_v53 }
 0x352   :  { %v705_v30 = vpop.xlane.xlu1 %704  ;;  %v693_v34 = vpop.xlane.xlu0 %692 }
 0x353   :  { %v737_v43 = vadd.f32 %v1233_v35, %v705_v30  ;;  %v733_v51 = vadd.f32 %v1233_v35, %v693_v34 }
 0x355   :  { %v819_v60 = vrot.slane %v737_v43, %v765_v41  ;;  %v792_v13 = vrot.slane %v733_v51, %v791_v63 }
 0x356   :  { %v714_v33 = vpop.xlane.xlu1 %713  ;;  %v696_v47 = vpop.xlane.xlu0 %695 }
 0x357   :  { %v740_v2 = vadd.f32 %v1233_v35, %v714_v33  ;;  %v734_v3 = vadd.f32 %v1233_v35, %v696_v47  ;;  %v794_v26 = vsel %vm793_vm5, %v792_v13, %v787_v23 }
 0x359   :  { %v833_v17 = vrot.slane %v740_v2, %v784_v56  ;;  %v799_v18 = vrot.slane %v734_v3, %v798_v0 }
 0x35a   :  { %v708_v38 = vpop.xlane.xlu1 %707  ;;  %v702_v9 = vpop.xlane.xlu0 %701 }
 0x35b   :  { %v738_v40 = vadd.f32 %v1233_v35, %v708_v38  ;;  %v736_v19 = vadd.f32 %v1233_v35, %v702_v9  ;;  %v801_v30 = vsel %vm800_vm6, %v799_v18, %v794_v26 }
 0x35d   :  { %v823_v50 = vrot.slane %v738_v40, %v770_v36  ;;  %v813_v31 = vrot.slane %v736_v19, %v812_v11  ;;  %v808_v36 = vsel %vm807_vm7, %v806_v29, %v801_v30 }
 0x35e   :  { %v723_v48 = vpop.xlane.xlu1 %722 }
 0x35f   :  { %v824_v4 = vsel %vm772_vm2, %v823_v50, %v819_v60  ;;  %v743_v22 = vadd.f32 %v1233_v35, %v723_v48  ;;  %v815_v38 = vsel %vm814_vm8, %v813_v31, %v808_v36 }
 0x360   :  { %v829_v14 = vsel %vm779_vm3, %v828_v7, %v824_v4 }
 0x361   :  { %v834_v24 = vsel %vm786_vm4, %v833_v17, %v829_v14  ;;  %v848_v33 = vrot.slane %v743_v22, %v805_v53 }
 0x362   :  { %v717_v1 = vpop.xlane.xlu1 %716 }
 0x363   :  { %v741_v5 = vadd.f32 %v1233_v35, %v717_v1 }
 0x365   :  { %v838_v15 = vrot.slane %v741_v5, %v791_v63 }
 0x366   :  { %v720_v16 = vpop.xlane.xlu1 %719 }
 0x367   :  { %v742_v20 = vadd.f32 %v1233_v35, %v720_v16  ;;  %v839_v27 = vsel %vm793_vm5, %v838_v15, %v834_v24 }
 0x369   :  { %v843_v25 = vrot.slane %v742_v20, %v798_v0 }
 0x36a   :  { %v726_v28 = vpop.xlane.xlu1 %725 }
 0x36b   :  { %v844_v32 = vsel %vm800_vm6, %v843_v25, %v839_v27  ;;  %v744_v59 = vadd.f32 %v1233_v35, %v726_v28 }
 0x36c   :  { %v849_v37 = vsel %vm807_vm7, %v848_v33, %v844_v32 }
 0x36d   :  { %v853_v34 = vrot.slane %v744_v59, %v812_v11 }
 0x36f   :  { %v854_v39 = vsel %vm814_vm8, %v853_v34, %v849_v37 }
 0x370   :  { %v856_v40 = vsel %vm855_vm9, %v854_v39, %v815_v38 }
 0x371   :  { %859 = vst.msk [vmem:[%s1282_s12] sm:$0x3] %vm858_vm10, %v856_v40 }

</bundles_post_ra>
